<compile_context>
chip_gen: v7x
topology: tpu7x:2x2x1
jax: 0.10.0
libtpu: 0.0.40
codegen_flags: <defaults>
</compile_context>

<pallas_src>
import functools

import jax
import jax.numpy as jnp
from jax.experimental import pallas as pl
from jax.experimental.pallas import tpu as pltpu

HIDDEN = 100        # logical hidden width (matches the PyTorch module)
HIDDEN_PAD = 128    # lane-padded hidden width
CLASS_PAD = 128     # lane-padded class width used inside the kernel
NEG_INF = -1e30     # baked into padded fc4-bias lanes


def _round_up(x, m):
    return (x + m - 1) // m * m


def _cdiv(a, b):
    return -(-a // b)


def _mlp_kernel(x_ref,
                w1_ref, b1_ref,
                w2_ref, b2_ref,
                w3_ref, b3_ref,
                w4_ref, b4_ref,
                o_ref, *, class_sub):
    """Fused MLP forward on one (tb, feat) batch tile.

    Weights are (in, out) bf16 zero-padded to 128-wide lanes; biases are
    (1, out) f32 (fc4's padded lanes hold -1e30). Matmuls accumulate in f32;
    all elementwise math stays f32. Output is the transposed, lane-dense
    (class_sub, tb) log-prob slab.
    """
    x = x_ref[...].astype(jnp.bfloat16)   # f32 -> bf16 on the VPU, hidden under MXU

    h = jnp.dot(x, w1_ref[...], preferred_element_type=jnp.float32) + b1_ref[...]
    h = jnp.maximum(h, 0.0)

    h = jnp.dot(h.astype(jnp.bfloat16), w2_ref[...],
                preferred_element_type=jnp.float32) + b2_ref[...]
    h = jnp.maximum(h, 0.0)

    h = jnp.dot(h.astype(jnp.bfloat16), w3_ref[...],
                preferred_element_type=jnp.float32) + b3_ref[...]
    h = jnp.maximum(h, 0.0)

    # Padded class lanes of b4 hold -1e30, so no iota/where mask is needed:
    # exp(padded - max) underflows to exactly 0 in the log_softmax below.
    logits = jnp.dot(h.astype(jnp.bfloat16), w4_ref[...],
                     preferred_element_type=jnp.float32) + b4_ref[...]

    # Numerically stable log_softmax over the (padded) class axis.
    m = jnp.max(logits, axis=-1, keepdims=True)
    shifted = logits - m
    lse = jnp.log(jnp.sum(jnp.exp(shifted), axis=-1, keepdims=True))
    res = shifted - lse                           # (tb, CLASS_PAD) f32

    # XLU transpose (free-ish slot) -> (CLASS_PAD, tb); store only the first
    # class_sub sublanes: ~16x less HBM writeback than a (tb, 128) f32 slab.
    res_t = jnp.transpose(res)
    o_ref[...] = res_t[:class_sub, :].astype(o_ref.dtype)


@functools.partial(jax.jit, static_argnames=("n_classes", "block_b"))
def mlp_forward(x, params, *, n_classes, block_b=2048):
    """x: (B, time_periods, 3) float32. Returns (B, n_classes) f32 log-probs."""
    b = x.shape[0]
    feat = x.shape[1] * x.shape[2]
    assert 0 < n_classes <= CLASS_PAD, "n_classes must be <= 128 for this kernel"

    x2d = x.reshape(b, feat)            # stays f32; cast to bf16 inside the kernel

    # --- batch tiling --------------------------------------------------------
    nt = max(1, _cdiv(b, block_b))
    if nt == 1 and b >= 512:
        nt = 2                           # v7x: give both TensorCores a grid step
    # Tile is a lane multiple so the transposed (class_sub, tb) output block is
    # lane-dense; padding waste is bounded to < 128 rows per tile.
    tb = _round_up(_cdiv(b, nt), 128)
    nt = max(1, _cdiv(b, tb))            # drop any fully-empty trailing block
    bp = nt * tb
    grid = (nt,)

    # Only the single-tile small-batch case needs a materialized pad; for
    # nt >= 2 the remainder is handled by a partial last block in the grid.
    if nt == 1 and b < tb:
        x2d = jnp.pad(x2d, ((0, tb - b), (0, 0)))

    class_sub = _round_up(n_classes, 8)  # sublane-padded class count in the output

    w1, b1, w2, b2, w3, b3, w4, b4 = params

    x_spec = pl.BlockSpec((tb, feat), lambda i: (i, 0))
    out_spec = pl.BlockSpec((class_sub, tb), lambda i: (0, i))

    def const_spec(arr):
        # Whole array, same block every grid step -> stays resident in VMEM.
        return pl.BlockSpec(arr.shape, lambda i: (0, 0))

    flops = 2 * bp * (feat * HIDDEN_PAD
                      + 2 * HIDDEN_PAD * HIDDEN_PAD
                      + HIDDEN_PAD * CLASS_PAD)
    bytes_accessed = (b * feat * 4
                      + sum(int(p.size) * p.dtype.itemsize for p in params)
                      + class_sub * bp * 4)

    out = pl.pallas_call(
        functools.partial(_mlp_kernel, class_sub=class_sub),
        out_shape=jax.ShapeDtypeStruct((class_sub, bp), jnp.float32),
        grid=grid,
        in_specs=[x_spec,
                  const_spec(w1), const_spec(b1),
                  const_spec(w2), const_spec(b2),
                  const_spec(w3), const_spec(b3),
                  const_spec(w4), const_spec(b4)],
        out_specs=out_spec,
        compiler_params=pltpu.CompilerParams(
            dimension_semantics=("parallel",)),
        cost_estimate=pl.CostEstimate(
            flops=flops,
            transcendentals=bp * (CLASS_PAD + 1),
            bytes_accessed=bytes_accessed),
    )(x2d, w1, b1, w2, b2, w3, b3, w4, b4)

    # Tiny (class_sub, bp) slab -> logical (B, n_classes).
    return out[:n_classes, :b].T


def init_params(key, time_periods, n_classes):
    """Deterministic init mirroring nn.Linear. Weights (in, out) bf16
    zero-padded to 128-wide lanes; biases (1, out) f32. fc4's padded bias
    lanes are set to -1e30 so the in-kernel log_softmax over the padded slab
    is exactly the log_softmax over the first n_classes lanes."""
    assert HIDDEN <= HIDDEN_PAD and n_classes <= CLASS_PAD
    feat = time_periods * 3
    dims = [(feat, HIDDEN), (HIDDEN, HIDDEN), (HIDDEN, HIDDEN), (HIDDEN, n_classes)]
    pads = [(feat, HIDDEN_PAD), (HIDDEN_PAD, HIDDEN_PAD),
            (HIDDEN_PAD, HIDDEN_PAD), (HIDDEN_PAD, CLASS_PAD)]
    params = []
    last = len(dims) - 1
    for i, ((fi, fo), (pi_, po)) in enumerate(zip(dims, pads)):
        kw, kb, key = jax.random.split(jax.random.fold_in(key, i), 3)
        bound = 1.0 / jnp.sqrt(fi)
        w = jax.random.uniform(kw, (fi, fo), jnp.float32, -bound, bound)
        bias = jax.random.uniform(kb, (1, fo), jnp.float32, -bound, bound)
        w = jnp.pad(w, ((0, pi_ - fi), (0, po - fo))).astype(jnp.bfloat16)
        # Hidden layers: padded bias lanes are 0 (ReLU keeps them at 0).
        # Last layer: padded class lanes get -1e30 (vanish in log_softmax).
        pad_val = NEG_INF if i == last else 0.0
        bias = jnp.pad(bias, ((0, 0), (0, po - fo)), constant_values=pad_val)
        params.extend([w, bias])
    return tuple(params)


def reference_forward(x, params, n_classes):
    """Pure-JAX reference mirroring the kernel's bf16-matmul / f32-accumulate math."""
    w1, b1, w2, b2, w3, b3, w4, b4 = params
    h = x.reshape(x.shape[0], -1).astype(jnp.bfloat16)
    h = jnp.maximum(jnp.dot(h, w1, preferred_element_type=jnp.float32) + b1, 0.0)
    h = jnp.maximum(jnp.dot(h.astype(jnp.bfloat16), w2,
                            preferred_element_type=jnp.float32) + b2, 0.0)
    h = jnp.maximum(jnp.dot(h.astype(jnp.bfloat16), w3,
                            preferred_element_type=jnp.float32) + b3, 0.0)
    logits = jnp.dot(h.astype(jnp.bfloat16), w4,
                     preferred_element_type=jnp.float32) + b4
    logits = logits[:, :n_classes]
    return jax.nn.log_softmax(logits, axis=-1)


if __name__ == "__main__":
    time_periods = 16   # in_features = 48
    n_classes = 6
    batch = 4

    key = jax.random.PRNGKey(0)
    kx, kp = jax.random.split(key)

    x = jax.random.normal(kx, (batch, time_periods, 3), jnp.float32)
    params = init_params(kp, time_periods, n_classes)

    out = mlp_forward(x, params, n_classes=n_classes)
    out = jax.block_until_ready(out)

    ref = reference_forward(x, params, n_classes)
    assert out.shape == (batch, n_classes)
    assert bool(jnp.all(jnp.isfinite(out)))
    assert jnp.allclose(out, ref, atol=1e-3, rtol=1e-3), "mismatch vs reference"

    print("KERNEL_OK")
</pallas_src>

<mosaic_0001>
module attributes {stable_mosaic.version = 11 : i64} {
  func.func @_mlp_kernel(%arg0: i32, %arg1: memref<128x48xf32, #tpu.memory_space<vmem>>, %arg2: memref<48x128xbf16, #tpu.memory_space<vmem>>, %arg3: memref<1x128xf32, #tpu.memory_space<vmem>>, %arg4: memref<128x128xbf16, #tpu.memory_space<vmem>>, %arg5: memref<1x128xf32, #tpu.memory_space<vmem>>, %arg6: memref<128x128xbf16, #tpu.memory_space<vmem>>, %arg7: memref<1x128xf32, #tpu.memory_space<vmem>>, %arg8: memref<128x128xbf16, #tpu.memory_space<vmem>>, %arg9: memref<1x128xf32, #tpu.memory_space<vmem>>, %arg10: memref<8x128xf32, #tpu.memory_space<vmem>>) attributes {dimension_semantics = [#tpu.dimension_semantics<parallel>], iteration_bounds = array<i64: 1>, scalar_prefetch = 0 : i64, scratch_operands = 0 : i64, tpu.core_type = #tpu.core_type<tc>, window_params = [{transform_indices = @transform_0, window_bounds = array<i64: 128, 48>}, {pipeline_mode = #tpu.pipeline_mode<synchronous>, transform_indices = @transform_1, window_bounds = array<i64: 48, 128>}, {pipeline_mode = #tpu.pipeline_mode<synchronous>, transform_indices = @transform_2, window_bounds = array<i64: 1, 128>}, {pipeline_mode = #tpu.pipeline_mode<synchronous>, transform_indices = @transform_3, window_bounds = array<i64: 128, 128>}, {pipeline_mode = #tpu.pipeline_mode<synchronous>, transform_indices = @transform_4, window_bounds = array<i64: 1, 128>}, {pipeline_mode = #tpu.pipeline_mode<synchronous>, transform_indices = @transform_5, window_bounds = array<i64: 128, 128>}, {pipeline_mode = #tpu.pipeline_mode<synchronous>, transform_indices = @transform_6, window_bounds = array<i64: 1, 128>}, {pipeline_mode = #tpu.pipeline_mode<synchronous>, transform_indices = @transform_7, window_bounds = array<i64: 128, 128>}, {pipeline_mode = #tpu.pipeline_mode<synchronous>, transform_indices = @transform_8, window_bounds = array<i64: 1, 128>}, {transform_indices = @transform_9, window_bounds = array<i64: 8, 128>}]} {
    %c0 = arith.constant 0 : index
    %c0_0 = arith.constant 0 : index
    %0 = vector.load %arg1[%c0, %c0_0] : memref<128x48xf32, #tpu.memory_space<vmem>>, vector<128x48xf32>
    %1 = arith.truncf %0 : vector<128x48xf32> to vector<128x48xbf16>
    %c0_1 = arith.constant 0 : index
    %c0_2 = arith.constant 0 : index
    %2 = vector.load %arg2[%c0_1, %c0_2] : memref<48x128xbf16, #tpu.memory_space<vmem>>, vector<48x128xbf16>
    %cst = arith.constant dense<0.000000e+00> : vector<128x128xf32>
    %3 = tpu.matmul %1, %2, %cst {dimension_numbers = #tpu.dot_dimension_numbers<[1], [0], [0], [1], [0, 0, 1, 1], [], []>} : vector<128x48xbf16>, vector<48x128xbf16>, vector<128x128xf32> -> vector<128x128xf32>
    %c0_3 = arith.constant 0 : index
    %c0_4 = arith.constant 0 : index
    %4 = vector.load %arg3[%c0_3, %c0_4] : memref<1x128xf32, #tpu.memory_space<vmem>>, vector<1x128xf32>
    %5 = vector.broadcast %4 : vector<1x128xf32> to vector<128x128xf32>
    %6 = arith.addf %3, %5 : vector<128x128xf32>
    %cst_5 = arith.constant 0.000000e+00 : f32
    %7 = vector.broadcast %cst_5 : f32 to vector<128x128xf32>
    %8 = arith.maximumf %6, %7 : vector<128x128xf32>
    %9 = arith.truncf %8 : vector<128x128xf32> to vector<128x128xbf16>
    %c0_6 = arith.constant 0 : index
    %c0_7 = arith.constant 0 : index
    %10 = vector.load %arg4[%c0_6, %c0_7] : memref<128x128xbf16, #tpu.memory_space<vmem>>, vector<128x128xbf16>
    %cst_8 = arith.constant dense<0.000000e+00> : vector<128x128xf32>
    %11 = tpu.matmul %9, %10, %cst_8 {dimension_numbers = #tpu.dot_dimension_numbers<[1], [0], [0], [1], [0, 0, 1, 1], [], []>} : vector<128x128xbf16>, vector<128x128xbf16>, vector<128x128xf32> -> vector<128x128xf32>
    %c0_9 = arith.constant 0 : index
    %c0_10 = arith.constant 0 : index
    %12 = vector.load %arg5[%c0_9, %c0_10] : memref<1x128xf32, #tpu.memory_space<vmem>>, vector<1x128xf32>
    %13 = vector.broadcast %12 : vector<1x128xf32> to vector<128x128xf32>
    %14 = arith.addf %11, %13 : vector<128x128xf32>
    %cst_11 = arith.constant 0.000000e+00 : f32
    %15 = vector.broadcast %cst_11 : f32 to vector<128x128xf32>
    %16 = arith.maximumf %14, %15 : vector<128x128xf32>
    %17 = arith.truncf %16 : vector<128x128xf32> to vector<128x128xbf16>
    %c0_12 = arith.constant 0 : index
    %c0_13 = arith.constant 0 : index
    %18 = vector.load %arg6[%c0_12, %c0_13] : memref<128x128xbf16, #tpu.memory_space<vmem>>, vector<128x128xbf16>
    %cst_14 = arith.constant dense<0.000000e+00> : vector<128x128xf32>
    %19 = tpu.matmul %17, %18, %cst_14 {dimension_numbers = #tpu.dot_dimension_numbers<[1], [0], [0], [1], [0, 0, 1, 1], [], []>} : vector<128x128xbf16>, vector<128x128xbf16>, vector<128x128xf32> -> vector<128x128xf32>
    %c0_15 = arith.constant 0 : index
    %c0_16 = arith.constant 0 : index
    %20 = vector.load %arg7[%c0_15, %c0_16] : memref<1x128xf32, #tpu.memory_space<vmem>>, vector<1x128xf32>
    %21 = vector.broadcast %20 : vector<1x128xf32> to vector<128x128xf32>
    %22 = arith.addf %19, %21 : vector<128x128xf32>
    %cst_17 = arith.constant 0.000000e+00 : f32
    %23 = vector.broadcast %cst_17 : f32 to vector<128x128xf32>
    %24 = arith.maximumf %22, %23 : vector<128x128xf32>
    %25 = arith.truncf %24 : vector<128x128xf32> to vector<128x128xbf16>
    %c0_18 = arith.constant 0 : index
    %c0_19 = arith.constant 0 : index
    %26 = vector.load %arg8[%c0_18, %c0_19] : memref<128x128xbf16, #tpu.memory_space<vmem>>, vector<128x128xbf16>
    %cst_20 = arith.constant dense<0.000000e+00> : vector<128x128xf32>
    %27 = tpu.matmul %25, %26, %cst_20 {dimension_numbers = #tpu.dot_dimension_numbers<[1], [0], [0], [1], [0, 0, 1, 1], [], []>} : vector<128x128xbf16>, vector<128x128xbf16>, vector<128x128xf32> -> vector<128x128xf32>
    %c0_21 = arith.constant 0 : index
    %c0_22 = arith.constant 0 : index
    %28 = vector.load %arg9[%c0_21, %c0_22] : memref<1x128xf32, #tpu.memory_space<vmem>>, vector<1x128xf32>
    %29 = vector.broadcast %28 : vector<1x128xf32> to vector<128x128xf32>
    %30 = arith.addf %27, %29 : vector<128x128xf32>
    %cst_23 = arith.constant dense<0xFF800000> : vector<128xf32>
    %31 = vector.multi_reduction <maximumf>, %30, %cst_23 [1] : vector<128x128xf32> to vector<128xf32>
    %32 = vector.shape_cast %31 : vector<128xf32> to vector<128x1xf32>
    %33 = vector.broadcast %32 : vector<128x1xf32> to vector<128x128xf32>
    %34 = arith.subf %30, %33 : vector<128x128xf32>
    %35 = math.exp %34 : vector<128x128xf32>
    %cst_24 = arith.constant dense<0.000000e+00> : vector<128xf32>
    %36 = vector.multi_reduction <add>, %35, %cst_24 [1] : vector<128x128xf32> to vector<128xf32>
    %37 = vector.shape_cast %36 : vector<128xf32> to vector<128x1xf32>
    %38 = math.log %37 : vector<128x1xf32>
    %39 = vector.broadcast %38 : vector<128x1xf32> to vector<128x128xf32>
    %40 = arith.subf %34, %39 : vector<128x128xf32>
    %41 = tpu.transpose %40, [1, 0] : vector<128x128xf32> -> vector<128x128xf32>
    %42 = vector.extract_strided_slice %41 {offsets = [0, 0], sizes = [8, 128], strides = [1, 1]} : vector<128x128xf32> to vector<8x128xf32>
    %c0_25 = arith.constant 0 : index
    %c0_26 = arith.constant 0 : index
    %43 = vector.load %arg10[%c0_25, %c0_26] : memref<8x128xf32, #tpu.memory_space<vmem>>, vector<8x128xf32>
    tpu.vector_store %arg10[%c0_25, %c0_26], %42 {strides = array<i32>} : memref<8x128xf32, #tpu.memory_space<vmem>>, vector<8x128xf32>,
    return
  }
  func.func @transform_0(%arg0: i32) -> (i32, i32) {
    %c0_i32 = arith.constant 0 : i32
    %c0_i32_0 = arith.constant 0 : i32
    return %arg0, %c0_i32 : i32, i32
  }
  func.func @transform_1(%arg0: i32) -> (i32, i32) {
    %c0_i32 = arith.constant 0 : i32
    %c0_i32_0 = arith.constant 0 : i32
    %c0_i32_1 = arith.constant 0 : i32
    return %c0_i32, %c0_i32_0 : i32, i32
  }
  func.func @transform_2(%arg0: i32) -> (i32, i32) {
    %c0_i32 = arith.constant 0 : i32
    %c0_i32_0 = arith.constant 0 : i32
    %c0_i32_1 = arith.constant 0 : i32
    return %c0_i32, %c0_i32_0 : i32, i32
  }
  func.func @transform_3(%arg0: i32) -> (i32, i32) {
    %c0_i32 = arith.constant 0 : i32
    %c0_i32_0 = arith.constant 0 : i32
    %c0_i32_1 = arith.constant 0 : i32
    return %c0_i32, %c0_i32_0 : i32, i32
  }
  func.func @transform_4(%arg0: i32) -> (i32, i32) {
    %c0_i32 = arith.constant 0 : i32
    %c0_i32_0 = arith.constant 0 : i32
    %c0_i32_1 = arith.constant 0 : i32
    return %c0_i32, %c0_i32_0 : i32, i32
  }
  func.func @transform_5(%arg0: i32) -> (i32, i32) {
    %c0_i32 = arith.constant 0 : i32
    %c0_i32_0 = arith.constant 0 : i32
    %c0_i32_1 = arith.constant 0 : i32
    return %c0_i32, %c0_i32_0 : i32, i32
  }
  func.func @transform_6(%arg0: i32) -> (i32, i32) {
    %c0_i32 = arith.constant 0 : i32
    %c0_i32_0 = arith.constant 0 : i32
    %c0_i32_1 = arith.constant 0 : i32
    return %c0_i32, %c0_i32_0 : i32, i32
  }
  func.func @transform_7(%arg0: i32) -> (i32, i32) {
    %c0_i32 = arith.constant 0 : i32
    %c0_i32_0 = arith.constant 0 : i32
    %c0_i32_1 = arith.constant 0 : i32
    return %c0_i32, %c0_i32_0 : i32, i32
  }
  func.func @transform_8(%arg0: i32) -> (i32, i32) {
    %c0_i32 = arith.constant 0 : i32
    %c0_i32_0 = arith.constant 0 : i32
    %c0_i32_1 = arith.constant 0 : i32
    return %c0_i32, %c0_i32_0 : i32, i32
  }
  func.func @transform_9(%arg0: i32) -> (i32, i32) {
    %c0_i32 = arith.constant 0 : i32
    %c0_i32_0 = arith.constant 0 : i32
    return %c0_i32, %arg0 : i32, i32
  }
}

</mosaic_0001>

<bundles_post_ra>
// kernel: mlp_forward.1
= control target key start
LH: loop header
LB: loop body
LE: loop exit
PB: predicated region body
PF: predicated region fallthrough
CT: control target
= control target key end

     0   :  { %vm88_vm0 = vcmask 392192   ;;  %s1628_s1 = inlined_call_operand.vmem [shape: bf16[48,128], index: 1, kind: input, shape index: {}]   ;;  %s1629_s0 = inlined_call_operand.vmem [shape: f32[128,48], index: 0, kind: input, shape index: {}]   ;;  %s1630_s3 = inlined_call_operand.vmem [shape: bf16[128,128], index: 3, kind: input, shape index: {}]   ;;  %s1631_s5 = inlined_call_operand.vmem [shape: bf16[128,128], index: 5, kind: input, shape index: {}]   ;;  %s1632_s2 = inlined_call_operand.vmem [shape: f32[1,128], index: 2, kind: input, shape index: {}]   ;;  %s1633_s7 = inlined_call_operand.vmem [shape: bf16[128,128], index: 7, kind: input, shape index: {}]   ;;  %s1634_s4 = inlined_call_operand.vmem [shape: f32[1,128], index: 4, kind: input, shape index: {}]   ;;  %s1635_s6 = inlined_call_operand.vmem [shape: f32[1,128], index: 6, kind: input, shape index: {}]   ;;  %s1636_s8 = inlined_call_operand.vmem [shape: f32[1,128], index: 8, kind: input, shape index: {}]   ;;  %s1637_s9 = inlined_call_operand.vmem [shape: f32[8,128], index: 9, kind: output, shape index: {}]  }
   0x1   :  { %v1215_v0 = vld [vmem:[%s1628_s1] sm:$0xff]   ;;  %v1216_v1 = vld [vmem:[%s1628_s1 + $0x8] sm:$0xff]   ;;  %v1217_v4 = vld [vmem:[%s1628_s1 + $0x10] sm:$0xff]  }
   0x2   :  { %1081 = vmatprep.subr.bf16.mxu0 %v1215_v0  ;;  %v33_v2 = vld [vmem:[%s1629_s0] sm:$0xff]  ;;  %v34_v3 = vld [vmem:[%s1629_s0 + $0x8] sm:$0xff]  ;;  %v35_v6 = vld [vmem:[%s1629_s0 + $0x10] sm:$0xff] }
   0x3   :  { %1082 = vmatpush3.bf16.msra.mxu0 %v1215_v0  ;;  %v49_v5 = vpack.c.bf16 %v34_v3, %v33_v2  ;;  %v36_v7 = vld [vmem:[%s1629_s0 + $0x18] sm:$0xff]  ;;  %v37_v8 = vld [vmem:[%s1629_s0 + $0x20] sm:$0xff]  ;;  %v38_v9 = vld [vmem:[%s1629_s0 + $0x28] sm:$0xff] }
   0x4   :  { %1083 = vmatprep.subr.bf16.mxu0 %v1216_v1  ;;  %v1218_v10 = vld [vmem:[%s1630_s3] sm:$0xff]   ;;  %v50_v11 = vpack.c.bf16 %v36_v7, %v35_v6  ;;  %v1219_v12 = vld [vmem:[%s1630_s3 + $0x8] sm:$0xff]   ;;  %v51_v13 = vpack.c.bf16 %v38_v9, %v37_v8  ;;  %v1220_v14 = vld [vmem:[%s1630_s3 + $0x10] sm:$0xff]  }
   0x5   :  { %1087 = vmatprep.mubr.msk.bf16.mxu0 %vm88_vm0, %v49_v5  ;;  %1103 = vmatprep.subr.bf16.mxu1 %v1218_v10  ;;  %v39_v15 = vld [vmem:[%s1629_s0 + $0x30] sm:$0xff]  ;;  %v40_v16 = vld [vmem:[%s1629_s0 + $0x38] sm:$0xff]  ;;  %v41_v17 = vld [vmem:[%s1629_s0 + $0x40] sm:$0xff] }
   0x6   :  { %1104 = vmatpush3.bf16.msra.mxu1 %v1218_v10  ;;  %v42_v18 = vld [vmem:[%s1629_s0 + $0x48] sm:$0xff]  ;;  %v1221_v19 = vld [vmem:[%s1630_s3 + $0x18] sm:$0xff]   ;;  %v52_v20 = vpack.c.bf16 %v40_v16, %v39_v15  ;;  %v1222_v22 = vld [vmem:[%s1630_s3 + $0x20] sm:$0xff]  }
   0x7   :  { %1084 = vmatpush3.bf16.msra.mxu0 %v1216_v1  ;;  %1105 = vmatprep.subr.bf16.mxu1 %v1219_v12  ;;  %v53_v21 = vpack.c.bf16 %v42_v18, %v41_v17  ;;  %v43_v23 = vld [vmem:[%s1629_s0 + $0x50] sm:$0xff]  ;;  %v44_v24 = vld [vmem:[%s1629_s0 + $0x58] sm:$0xff]  ;;  %v45_v25 = vld [vmem:[%s1629_s0 + $0x60] sm:$0xff] }
   0x8   :  { %1085 = vmatprep.subr.bf16.mxu0 %v1217_v4  ;;  %v46_v26 = vld [vmem:[%s1629_s0 + $0x68] sm:$0xff]  ;;  %v54_v28 = vpack.c.bf16 %v44_v24, %v43_v23  ;;  %v47_v30 = vld [vmem:[%s1629_s0 + $0x70] sm:$0xff]  ;;  %v48_v31 = vld [vmem:[%s1629_s0 + $0x78] sm:$0xff] }
   0x9   :  { %v1223_v27 = vld [vmem:[%s1630_s3 + $0x28] sm:$0xff]   ;;  %v55_v29 = vpack.c.bf16 %v46_v26, %v45_v25  ;;  %v56_v32 = vpack.c.bf16 %v48_v31, %v47_v30  ;;  %v1224_v33 = vld [vmem:[%s1630_s3 + $0x30] sm:$0xff]   ;;  %v1225_v34 = vld [vmem:[%s1630_s3 + $0x38] sm:$0xff]  }
   0xa   :  { %1106 = vmatpush3.bf16.msra.mxu1 %v1219_v12  ;;  %v1226_v35 = vld [vmem:[%s1631_s5] sm:$0xff]   ;;  %v1227_v36 = vld [vmem:[%s1631_s5 + $0x8] sm:$0xff]   ;;  %v1228_v37 = vld [vmem:[%s1631_s5 + $0x10] sm:$0xff]  }
   0xb   :  { %1086 = vmatpush3.bf16.msra.mxu0 %v1217_v4  ;;  %1107 = vmatprep.subr.bf16.mxu1 %v1220_v14  ;;  %v1229_v38 = vld [vmem:[%s1631_s5 + $0x18] sm:$0xff]   ;;  %v1230_v39 = vld [vmem:[%s1631_s5 + $0x20] sm:$0xff]   ;;  %v1231_v40 = vld [vmem:[%s1631_s5 + $0x28] sm:$0xff]  }
   0xc   :  { %1135 = vmatprep.subr.bf16.mxu0 %v1226_v35  ;;  %v983_v41 = vld [vmem:[%s1632_s2] ss:$0 sm:$0xff] }
   0xe   :  { %1088 = vmatmul.mubr.msk.bf16.vlgmr.msra.gmra.mrb[0].mxu0 %vm88_vm0, %v50_v11  ;;  %1108 = vmatpush3.bf16.msra.mxu1 %v1220_v14 }
   0xf   :  { %1091 = vmatprep.mubr.msk.bf16.mxu0 %vm88_vm0, %v51_v13  ;;  %1109 = vmatprep.subr.bf16.mxu1 %v1221_v19 }
  0x10   :  { %1136 = vmatpush3.bf16.msra.mxu0 %v1226_v35  ;;  %v1233_v35 = vld [vmem:[%s1631_s5 + $0x38] sm:$0xff]  }
  0x11   :  { %1137 = vmatprep.subr.bf16.mxu0 %v1227_v36 }
  0x12   :  { %1110 = vmatpush3.bf16.msra.mxu1 %v1221_v19 }
  0x13   :  { %1111 = vmatprep.subr.bf16.mxu1 %v1222_v22 }
  0x14   :  { %1138 = vmatpush3.bf16.msra.mxu0 %v1227_v36  ;;  %v1234_v36 = vld [vmem:[%s1633_s7] sm:$0xff]  }
  0x15   :  { %1139 = vmatprep.subr.bf16.mxu0 %v1228_v37 }
  0x16   :  { %1092 = vmatmul.mubr.msk.bf16.gmra.mrb[4].mxu0 %vm88_vm0, %v52_v20  ;;  %1112 = vmatpush3.bf16.msra.mxu1 %v1222_v22 }
  0x17   :  { %1095 = vmatprep.mubr.msk.bf16.mxu0 %vm88_vm0, %v53_v21  ;;  %1113 = vmatprep.subr.bf16.mxu1 %v1223_v27 }
  0x18   :  { %1140 = vmatpush3.bf16.msra.mxu0 %v1228_v37  ;;  %v1235_v37 = vld [vmem:[%s1633_s7 + $0x8] sm:$0xff]  }
  0x19   :  { %1141 = vmatprep.subr.bf16.mxu0 %v1229_v38 }
  0x1a   :  { %1114 = vmatpush3.bf16.msra.mxu1 %v1223_v27 }
  0x1b   :  { %1115 = vmatprep.subr.bf16.mxu1 %v1224_v33 }
  0x1c   :  { %1142 = vmatpush3.bf16.msra.mxu0 %v1229_v38  ;;  %v1236_v38 = vld [vmem:[%s1633_s7 + $0x10] sm:$0xff]  }
  0x1d   :  { %1143 = vmatprep.subr.bf16.mxu0 %v1230_v39 }
  0x1e   :  { %1096 = vmatmul.mubr.msk.bf16.gmra.mrb[8].mxu0 %vm88_vm0, %v54_v28  ;;  %1116 = vmatpush3.bf16.msra.mxu1 %v1224_v33 }
  0x1f   :  { %1099 = vmatprep.mubr.msk.bf16.mxu0 %vm88_vm0, %v55_v29  ;;  %1117 = vmatprep.subr.bf16.mxu1 %v1225_v34 }
  0x20   :  { %1144 = vmatpush3.bf16.msra.mxu0 %v1230_v39  ;;  %v1484_v39 = vld [vmem:[%s1633_s7 + $0x18] sm:$0xff]  }
  0x21   :  { %1145 = vmatprep.subr.bf16.mxu0 %v1231_v40 }
  0x22   :  { %1118 = vmatpush3.bf16.msra.mxu1 %v1225_v34  ;;  %v1232_v34 = vld [vmem:[%s1631_s5 + $0x30] sm:$0xff]  }
  0x23   :  { %1199 = vmatprep.subr.bf16.mxu1 %v1234_v36 }
  0x24   :  { %1146 = vmatpush3.bf16.msra.mxu0 %v1231_v40  ;;  %v1490_v40 = vld [vmem:[%s1633_s7 + $0x20] sm:$0xff]  }
  0x25   :  { %1147 = vmatprep.subr.bf16.mxu0 %v1232_v34 }
  0x26   :  { %1100 = vmatmul.mubr.msk.bf16.gmra.mrb[12].mxu0 %vm88_vm0, %v56_v32 }
  0x28   :  { %1148 = vmatpush3.bf16.msra.mxu0 %v1232_v34 }
  0x29   :  { %1149 = vmatprep.subr.bf16.mxu0 %v1233_v35 }
  0x2c   :  { %1150 = vmatpush3.bf16.msra.mxu0 %v1233_v35  ;;  %v1240_v35 = vld [vmem:[%s1633_s7 + $0x30] sm:$0xff]  }
  0x2d   :  { %1167 = vmatprep.subr.bf16.mxu0 %v1234_v36 }
  0xe1   :  { %v1089_v42 = vpop.f32.mrb[0].mxu0 }
  0xe2   :  { %v156_v43 = vadd.f32 %v1089_v42, %v983_v41  ;;  %v147_v44 = vpop.f32.mrb[1].mxu0  ;;  %v1505_v42 = vld [vmem:[%s1634_s4] ss:$0 sm:$0xff] }
  0xe3   :  { %v148_v45 = vadd.f32 %v983_v41, %v147_v44  ;;  %v1090_v46 = vpop.f32.mrb[2].mxu0 }
  0xe4   :  { %v159_v47 = vadd.f32 %v1090_v46, %v983_v41  ;;  %v150_v48 = vpop.f32.mrb[3].mxu0  ;;  %v212_v50 = vmax.f32 %v156_v43, 0.0 }
  0xe5   :  { %v151_v49 = vadd.f32 %v983_v41, %v150_v48  ;;  %v210_v52 = vmax.f32 %v148_v45, 0.0 }
  0xe6   :  { %v213_v51 = vmax.f32 %v159_v47, 0.0 }
  0xe7   :  { %v211_v53 = vmax.f32 %v151_v49, 0.0 }
  0xe8   :  { %v227_v54 = vpack.c.bf16 %v213_v51, %v212_v50 }
  0xe9   :  { %v1093_v55 = vpop.f32.mrb[4].mxu0  ;;  %v226_v56 = vpack.c.bf16 %v211_v53, %v210_v52 }
  0xea   :  { %v172_v57 = vadd.f32 %v1093_v55, %v983_v41  ;;  %v163_v58 = vpop.f32.mrb[5].mxu0 }
  0xeb   :  { %v164_v59 = vadd.f32 %v983_v41, %v163_v58  ;;  %v1094_v60 = vpop.f32.mrb[6].mxu0  ;;  %1119 = vmatprep.mubr.bf16.mxu1 %v226_v56 }
  0xec   :  { %v216_v61 = vmax.f32 %v172_v57, 0.0  ;;  %v175_v62 = vadd.f32 %v1094_v60, %v983_v41  ;;  %v166_v63 = vpop.f32.mrb[7].mxu0  ;;  %1120 = vmatmul.mubr.bf16.vlgmr.msra.gmra.mrb[0].mxu1 %v227_v54 }
  0xed   :  { %v214_v0 = vmax.f32 %v164_v59, 0.0  ;;  %v167_v1 = vadd.f32 %v983_v41, %v166_v63  ;;  %1207 = vmatpush3.bf16.msra.mxu1 %v1234_v36 }
  0xee   :  { %v217_v2 = vmax.f32 %v175_v62, 0.0  ;;  %1200 = vmatprep.subr.bf16.mxu1 %v1235_v37 }
  0xef   :  { %v215_v3 = vmax.f32 %v167_v1, 0.0 }
  0xf0   :  { %v229_v4 = vpack.c.bf16 %v217_v2, %v216_v61 }
  0xf1   :  { %v228_v5 = vpack.c.bf16 %v215_v3, %v214_v0  ;;  %v1097_v6 = vpop.f32.mrb[8].mxu0  ;;  %1208 = vmatpush3.bf16.msra.mxu1 %v1235_v37 }
  0xf2   :  { %v188_v7 = vadd.f32 %v1097_v6, %v983_v41  ;;  %v179_v8 = vpop.f32.mrb[9].mxu0  ;;  %1201 = vmatprep.subr.bf16.mxu1 %v1236_v38 }
  0xf3   :  { %v180_v9 = vadd.f32 %v983_v41, %v179_v8  ;;  %v1098_v10 = vpop.f32.mrb[10].mxu0  ;;  %1123 = vmatprep.mubr.bf16.mxu1 %v228_v5 }
  0xf4   :  { %v220_v11 = vmax.f32 %v188_v7, 0.0  ;;  %v191_v12 = vadd.f32 %v1098_v10, %v983_v41  ;;  %v182_v13 = vpop.f32.mrb[11].mxu0  ;;  %1124 = vmatmul.mubr.bf16.gmra.mrb[4].mxu1 %v229_v4 }
  0xf5   :  { %v218_v14 = vmax.f32 %v180_v9, 0.0  ;;  %v183_v15 = vadd.f32 %v983_v41, %v182_v13  ;;  %1209 = vmatpush3.bf16.msra.mxu1 %v1236_v38 }
  0xf6   :  { %v221_v16 = vmax.f32 %v191_v12, 0.0  ;;  %1202 = vmatprep.subr.bf16.mxu1 %v1484_v39 }
  0xf7   :  { %v219_v17 = vmax.f32 %v183_v15, 0.0 }
  0xf8   :  { %v231_v18 = vpack.c.bf16 %v221_v16, %v220_v11 }
  0xf9   :  { %v230_v19 = vpack.c.bf16 %v219_v17, %v218_v14  ;;  %v1101_v20 = vpop.f32.mrb[12].mxu0  ;;  %1210 = vmatpush3.bf16.msra.mxu1 %v1484_v39 }
  0xfa   :  { %v204_v21 = vadd.f32 %v1101_v20, %v983_v41  ;;  %v195_v22 = vpop.f32.mrb[13].mxu0  ;;  %1203 = vmatprep.subr.bf16.mxu1 %v1490_v40 }
  0xfb   :  { %v196_v23 = vadd.f32 %v983_v41, %v195_v22  ;;  %v1102_v24 = vpop.f32.mrb[14].mxu0  ;;  %1127 = vmatprep.mubr.bf16.mxu1 %v230_v19 }
  0xfc   :  { %v224_v25 = vmax.f32 %v204_v21, 0.0  ;;  %v207_v26 = vadd.f32 %v1102_v24, %v983_v41  ;;  %v198_v27 = vpop.f32.mrb[15].mxu0  ;;  %1128 = vmatmul.mubr.bf16.gmra.mrb[8].mxu1 %v231_v18 }
  0xfd   :  { %v222_v28 = vmax.f32 %v196_v23, 0.0  ;;  %v199_v29 = vadd.f32 %v983_v41, %v198_v27  ;;  %v1497_v41 = vld [vmem:[%s1633_s7 + $0x28] sm:$0xff]   ;;  %1211 = vmatpush3.bf16.msra.mxu1 %v1490_v40 }
  0xfe   :  { %v225_v30 = vmax.f32 %v207_v26, 0.0  ;;  %1204 = vmatprep.subr.bf16.mxu1 %v1497_v41 }
  0xff   :  { %v223_v31 = vmax.f32 %v199_v29, 0.0 }
 0x100   :  { %v233_v32 = vpack.c.bf16 %v225_v30, %v224_v25 }
 0x101   :  { %v232_v33 = vpack.c.bf16 %v223_v31, %v222_v28  ;;  %1212 = vmatpush3.bf16.msra.mxu1 %v1497_v41 }
 0x102   :  { %1205 = vmatprep.subr.bf16.mxu1 %v1240_v35 }
 0x103   :  { %1131 = vmatprep.mubr.bf16.mxu1 %v232_v33 }
 0x104   :  { %1132 = vmatmul.mubr.bf16.gmra.mrb[12].mxu1 %v233_v32 }
 0x105   :  { %1213 = vmatpush3.bf16.msra.mxu1 %v1240_v35 }
 0x1bf   :  { %v1121_v43 = vpop.f32.mrb[0].mxu1 }
 0x1c0   :  { %v348_v44 = vadd.f32 %v1121_v43, %v1505_v42  ;;  %v339_v45 = vpop.f32.mrb[1].mxu1 }
 0x1c1   :  { %v340_v46 = vadd.f32 %v1505_v42, %v339_v45  ;;  %v1122_v47 = vpop.f32.mrb[2].mxu1 }
 0x1c2   :  { %v351_v48 = vadd.f32 %v1122_v47, %v1505_v42  ;;  %v342_v49 = vpop.f32.mrb[3].mxu1  ;;  %v404_v51 = vmax.f32 %v348_v44, 0.0 }
 0x1c3   :  { %v343_v50 = vadd.f32 %v1505_v42, %v342_v49  ;;  %v402_v53 = vmax.f32 %v340_v46, 0.0 }
 0x1c4   :  { %v405_v52 = vmax.f32 %v351_v48, 0.0 }
 0x1c5   :  { %v403_v54 = vmax.f32 %v343_v50, 0.0 }
 0x1c6   :  { %v419_v55 = vpack.c.bf16 %v405_v52, %v404_v51 }
 0x1c7   :  { %v418_v56 = vpack.c.bf16 %v403_v54, %v402_v53  ;;  %v1125_v57 = vpop.f32.mrb[4].mxu1 }
 0x1c8   :  { %v364_v58 = vadd.f32 %v1125_v57, %v1505_v42  ;;  %v355_v59 = vpop.f32.mrb[5].mxu1 }
 0x1c9   :  { %v356_v60 = vadd.f32 %v1505_v42, %v355_v59  ;;  %v1126_v61 = vpop.f32.mrb[6].mxu1  ;;  %1151 = vmatprep.mubr.bf16.mxu0 %v418_v56 }
 0x1ca   :  { %v367_v62 = vadd.f32 %v1126_v61, %v1505_v42  ;;  %v358_v63 = vpop.f32.mrb[7].mxu1  ;;  %1152 = vmatmul.mubr.bf16.vlgmr.msra.gmra.mrb[16].mxu0 %v419_v55  ;;  %v408_v1 = vmax.f32 %v364_v58, 0.0 }
 0x1cb   :  { %v359_v0 = vadd.f32 %v1505_v42, %v358_v63  ;;  %1168 = vmatpush3.bf16.msra.mxu0 %v1234_v36  ;;  %v406_v3 = vmax.f32 %v356_v60, 0.0  ;;  %v1241_v36 = vld [vmem:[%s1633_s7 + $0x38] sm:$0xff]  }
 0x1cc   :  { %v409_v2 = vmax.f32 %v367_v62, 0.0  ;;  %1169 = vmatprep.subr.bf16.mxu0 %v1235_v37  ;;  %1206 = vmatprep.subr.bf16.mxu1 %v1241_v36 }
 0x1cd   :  { %v407_v4 = vmax.f32 %v359_v0, 0.0  ;;  %1214 = vmatpush3.bf16.msra.mxu1 %v1241_v36 }
 0x1ce   :  { %v421_v5 = vpack.c.bf16 %v409_v2, %v408_v1 }
 0x1cf   :  { %v420_v6 = vpack.c.bf16 %v407_v4, %v406_v3  ;;  %v1129_v7 = vpop.f32.mrb[8].mxu1  ;;  %1170 = vmatpush3.bf16.msra.mxu0 %v1235_v37  ;;  %v1004_v37 = vld [vmem:[%s1635_s6] ss:$0 sm:$0xff] }
 0x1d0   :  { %v380_v8 = vadd.f32 %v1129_v7, %v1505_v42  ;;  %v371_v9 = vpop.f32.mrb[9].mxu1  ;;  %1171 = vmatprep.subr.bf16.mxu0 %v1236_v38 }
 0x1d1   :  { %v372_v10 = vadd.f32 %v1505_v42, %v371_v9  ;;  %v1130_v11 = vpop.f32.mrb[10].mxu1  ;;  %1155 = vmatprep.mubr.bf16.mxu0 %v420_v6 }
 0x1d2   :  { %v412_v12 = vmax.f32 %v380_v8, 0.0  ;;  %v383_v13 = vadd.f32 %v1130_v11, %v1505_v42  ;;  %v374_v14 = vpop.f32.mrb[11].mxu1  ;;  %1156 = vmatmul.mubr.bf16.gmra.mrb[20].mxu0 %v421_v5 }
 0x1d3   :  { %v410_v15 = vmax.f32 %v372_v10, 0.0  ;;  %v375_v16 = vadd.f32 %v1505_v42, %v374_v14  ;;  %1172 = vmatpush3.bf16.msra.mxu0 %v1236_v38 }
 0x1d4   :  { %v413_v17 = vmax.f32 %v383_v13, 0.0  ;;  %1173 = vmatprep.subr.bf16.mxu0 %v1484_v39 }
 0x1d5   :  { %v411_v18 = vmax.f32 %v375_v16, 0.0 }
 0x1d6   :  { %v423_v19 = vpack.c.bf16 %v413_v17, %v412_v12 }
 0x1d7   :  { %v422_v20 = vpack.c.bf16 %v411_v18, %v410_v15  ;;  %v1133_v21 = vpop.f32.mrb[12].mxu1  ;;  %1174 = vmatpush3.bf16.msra.mxu0 %v1484_v39 }
 0x1d8   :  { %v396_v22 = vadd.f32 %v1133_v21, %v1505_v42  ;;  %v387_v23 = vpop.f32.mrb[13].mxu1  ;;  %1175 = vmatprep.subr.bf16.mxu0 %v1490_v40 }
 0x1d9   :  { %v388_v24 = vadd.f32 %v1505_v42, %v387_v23  ;;  %v1134_v25 = vpop.f32.mrb[14].mxu1  ;;  %1159 = vmatprep.mubr.bf16.mxu0 %v422_v20 }
 0x1da   :  { %v416_v26 = vmax.f32 %v396_v22, 0.0  ;;  %v399_v27 = vadd.f32 %v1134_v25, %v1505_v42  ;;  %v390_v28 = vpop.f32.mrb[15].mxu1  ;;  %1160 = vmatmul.mubr.bf16.gmra.mrb[24].mxu0 %v423_v19 }
 0x1db   :  { %v414_v29 = vmax.f32 %v388_v24, 0.0  ;;  %v391_v30 = vadd.f32 %v1505_v42, %v390_v28  ;;  %1176 = vmatpush3.bf16.msra.mxu0 %v1490_v40 }
 0x1dc   :  { %v417_v31 = vmax.f32 %v399_v27, 0.0  ;;  %1177 = vmatprep.subr.bf16.mxu0 %v1497_v41 }
 0x1dd   :  { %v415_v32 = vmax.f32 %v391_v30, 0.0  ;;  %v1013_v30 = vld [vmem:[%s1636_s8] ss:$0 sm:$0xff] }
 0x1de   :  { %v425_v33 = vpack.c.bf16 %v417_v31, %v416_v26 }
 0x1df   :  { %v424_v34 = vpack.c.bf16 %v415_v32, %v414_v29  ;;  %1178 = vmatpush3.bf16.msra.mxu0 %v1497_v41 }
 0x1e0   :  { %1179 = vmatprep.subr.bf16.mxu0 %v1240_v35 }
 0x1e1   :  { %1163 = vmatprep.mubr.bf16.mxu0 %v424_v34 }
 0x1e2   :  { %1164 = vmatmul.mubr.bf16.gmra.mrb[28].mxu0 %v425_v33 }
 0x1e3   :  { %1180 = vmatpush3.bf16.msra.mxu0 %v1240_v35 }
 0x1e4   :  { %1181 = vmatprep.subr.bf16.mxu0 %v1241_v36 }
 0x1e7   :  { %1182 = vmatpush3.bf16.msra.mxu0 %v1241_v36 }
 0x29d   :  { %v1153_v38 = vpop.f32.mrb[16].mxu0 }
 0x29e   :  { %v540_v39 = vadd.f32 %v1153_v38, %v1004_v37  ;;  %v531_v40 = vpop.f32.mrb[17].mxu0 }
 0x29f   :  { %v532_v41 = vadd.f32 %v1004_v37, %v531_v40  ;;  %v1154_v42 = vpop.f32.mrb[18].mxu0 }
 0x2a0   :  { %v543_v43 = vadd.f32 %v1154_v42, %v1004_v37  ;;  %v534_v44 = vpop.f32.mrb[19].mxu0  ;;  %v596_v46 = vmax.f32 %v540_v39, 0.0 }
 0x2a1   :  { %v535_v45 = vadd.f32 %v1004_v37, %v534_v44  ;;  %v594_v48 = vmax.f32 %v532_v41, 0.0 }
 0x2a2   :  { %v597_v47 = vmax.f32 %v543_v43, 0.0 }
 0x2a3   :  { %v595_v49 = vmax.f32 %v535_v45, 0.0 }
 0x2a4   :  { %v611_v50 = vpack.c.bf16 %v597_v47, %v596_v46 }
 0x2a5   :  { %v610_v51 = vpack.c.bf16 %v595_v49, %v594_v48  ;;  %v1157_v52 = vpop.f32.mrb[20].mxu0 }
 0x2a6   :  { %v556_v53 = vadd.f32 %v1157_v52, %v1004_v37  ;;  %v547_v54 = vpop.f32.mrb[21].mxu0 }
 0x2a7   :  { %v548_v55 = vadd.f32 %v1004_v37, %v547_v54  ;;  %v1158_v56 = vpop.f32.mrb[22].mxu0  ;;  %1183 = vmatprep.mubr.bf16.mxu0 %v610_v51 }
 0x2a8   :  { %v559_v57 = vadd.f32 %v1158_v56, %v1004_v37  ;;  %v550_v58 = vpop.f32.mrb[23].mxu0  ;;  %1184 = vmatmul.mubr.bf16.vlgmr.msra.gmra.mrb[32].mxu0 %v611_v50  ;;  %v600_v60 = vmax.f32 %v556_v53, 0.0 }
 0x2a9   :  { %v551_v59 = vadd.f32 %v1004_v37, %v550_v58  ;;  %v598_v62 = vmax.f32 %v548_v55, 0.0 }
 0x2aa   :  { %v601_v61 = vmax.f32 %v559_v57, 0.0 }
 0x2ab   :  { %v599_v63 = vmax.f32 %v551_v59, 0.0 }
 0x2ac   :  { %v613_v0 = vpack.c.bf16 %v601_v61, %v600_v60 }
 0x2ad   :  { %v612_v1 = vpack.c.bf16 %v599_v63, %v598_v62  ;;  %v1161_v2 = vpop.f32.mrb[24].mxu0 }
 0x2ae   :  { %v572_v3 = vadd.f32 %v1161_v2, %v1004_v37  ;;  %v563_v4 = vpop.f32.mrb[25].mxu0 }
 0x2af   :  { %v564_v5 = vadd.f32 %v1004_v37, %v563_v4  ;;  %v1162_v6 = vpop.f32.mrb[26].mxu0  ;;  %1187 = vmatprep.mubr.bf16.mxu1 %v612_v1 }
 0x2b0   :  { %v604_v7 = vmax.f32 %v572_v3, 0.0  ;;  %v575_v8 = vadd.f32 %v1162_v6, %v1004_v37  ;;  %v566_v9 = vpop.f32.mrb[27].mxu0  ;;  %1188 = vmatmul.mubr.bf16.vlgmr.msra.gmra.mrb[16].mxu1 %v613_v0 }
 0x2b1   :  { %v602_v10 = vmax.f32 %v564_v5, 0.0  ;;  %v567_v11 = vadd.f32 %v1004_v37, %v566_v9 }
 0x2b2   :  { %v605_v12 = vmax.f32 %v575_v8, 0.0 }
 0x2b3   :  { %v603_v13 = vmax.f32 %v567_v11, 0.0 }
 0x2b4   :  { %v615_v14 = vpack.c.bf16 %v605_v12, %v604_v7 }
 0x2b5   :  { %v614_v15 = vpack.c.bf16 %v603_v13, %v602_v10  ;;  %v1165_v16 = vpop.f32.mrb[28].mxu0 }
 0x2b6   :  { %v588_v17 = vadd.f32 %v1165_v16, %v1004_v37  ;;  %v579_v18 = vpop.f32.mrb[29].mxu0 }
 0x2b7   :  { %v580_v19 = vadd.f32 %v1004_v37, %v579_v18  ;;  %v1166_v20 = vpop.f32.mrb[30].mxu0  ;;  %1191 = vmatprep.mubr.bf16.mxu1 %v614_v15 }
 0x2b8   :  { %v608_v21 = vmax.f32 %v588_v17, 0.0  ;;  %v591_v22 = vadd.f32 %v1166_v20, %v1004_v37  ;;  %v582_v23 = vpop.f32.mrb[31].mxu0  ;;  %1192 = vmatmul.mubr.bf16.gmra.mrb[20].mxu1 %v615_v14 }
 0x2b9   :  { %v606_v24 = vmax.f32 %v580_v19, 0.0  ;;  %v583_v25 = vadd.f32 %v1004_v37, %v582_v23 }
 0x2ba   :  { %v609_v26 = vmax.f32 %v591_v22, 0.0 }
 0x2bb   :  { %v607_v27 = vmax.f32 %v583_v25, 0.0 }
 0x2bc   :  { %v617_v28 = vpack.c.bf16 %v609_v26, %v608_v21 }
 0x2bd   :  { %v616_v29 = vpack.c.bf16 %v607_v27, %v606_v24 }
 0x2bf   :  { %1195 = vmatprep.mubr.bf16.mxu1 %v616_v29 }
 0x2c0   :  { %1196 = vmatmul.mubr.bf16.gmra.mrb[24].mxu1 %v617_v28 }
 0x37b   :  { %v1185_v31 = vpop.f32.mrb[32].mxu0 }
 0x37c   :  { %v732_v32 = vadd.f32 %v1185_v31, %v1013_v30  ;;  %v723_v33 = vpop.f32.mrb[33].mxu0 }
 0x37d   :  { %v724_v34 = vadd.f32 %v1013_v30, %v723_v33  ;;  %v1186_v35 = vpop.f32.mrb[34].mxu0 }
 0x37e   :  { %790 = vmax.xlane.f32.xlu1 %v732_v32  ;;  %v726_v36 = vpop.f32.mrb[35].mxu0  ;;  %v735_v38 = vadd.f32 %v1186_v35, %v1013_v30 }
 0x37f   :  { %786 = vmax.xlane.f32.xlu0 %v724_v34  ;;  %v727_v37 = vadd.f32 %v1013_v30, %v726_v36 }
 0x382   :  { %792 = vmax.xlane.f32.xlu1 %v735_v38 }
 0x383   :  { %v1189_v39 = vpop.f32.mrb[16].mxu1  ;;  %788 = vmax.xlane.f32.xlu0 %v727_v37 }
 0x384   :  { %v739_v40 = vpop.f32.mrb[17].mxu1  ;;  %v748_v45 = vadd.f32 %v1189_v39, %v1013_v30 }
 0x385   :  { %v740_v41 = vadd.f32 %v1013_v30, %v739_v40  ;;  %v1190_v42 = vpop.f32.mrb[18].mxu1 }
 0x386   :  { %v742_v43 = vpop.f32.mrb[19].mxu1  ;;  %v751_v46 = vadd.f32 %v1190_v42, %v1013_v30 }
 0x387   :  { %v743_v44 = vadd.f32 %v1013_v30, %v742_v43  ;;  %794 = vmax.xlane.f32.xlu0 %v740_v41 }
 0x389   :  { %796 = vmax.xlane.f32.xlu1 %v743_v44 }
 0x38b   :  { %v1193_v47 = vpop.f32.mrb[20].mxu1  ;;  %798 = vmax.xlane.f32.xlu0 %v748_v45 }
 0x38c   :  { %v755_v48 = vpop.f32.mrb[21].mxu1  ;;  %v764_v53 = vadd.f32 %v1193_v47, %v1013_v30 }
 0x38d   :  { %v756_v49 = vadd.f32 %v1013_v30, %v755_v48  ;;  %v1194_v50 = vpop.f32.mrb[22].mxu1  ;;  %800 = vmax.xlane.f32.xlu1 %v751_v46 }
 0x38e   :  { %v758_v51 = vpop.f32.mrb[23].mxu1  ;;  %v1541_v54 = vadd.f32 %v1194_v50, %v1013_v30 }
 0x38f   :  { %v759_v52 = vadd.f32 %v1013_v30, %v758_v51  ;;  %802 = vmax.xlane.f32.xlu0 %v756_v49 }
 0x391   :  { %804 = vmax.xlane.f32.xlu1 %v759_v52 }
 0x393   :  { %v1197_v55 = vpop.f32.mrb[24].mxu1  ;;  %806 = vmax.xlane.f32.xlu0 %v764_v53 }
 0x394   :  { %v771_v56 = vpop.f32.mrb[25].mxu1  ;;  %v1546_v60 = vadd.f32 %v1197_v55, %v1013_v30 }
 0x395   :  { %v1543_v57 = vadd.f32 %v1013_v30, %v771_v56  ;;  %v1198_v58 = vpop.f32.mrb[26].mxu1  ;;  %808 = vmax.xlane.f32.xlu1 %v1541_v54 }
 0x396   :  { %v774_v59 = vpop.f32.mrb[27].mxu1  ;;  %v1551_v62 = vadd.f32 %v1198_v58, %v1013_v30 }
 0x397   :  { %v1548_v61 = vadd.f32 %v1013_v30, %v774_v59  ;;  %810 = vmax.xlane.f32.xlu0 %v1543_v57 }
 0x399   :  { %812 = vmax.xlane.f32.xlu1 %v1548_v61 }
 0x39b   :  { %814 = vmax.xlane.f32.xlu0 %v1546_v60 }
 0x39d   :  { %816 = vmax.xlane.f32.xlu1 %v1551_v62 }
 0x40b   :  { %v791_v63 = vpop.xlane.xlu1 %790 }
 0x40c   :  { %v1556_v0 = vsub.f32 %v732_v32, %v791_v63  ;;  %v787_v1 = vpop.xlane.xlu0 %786 }
 0x40d   :  { %v1558_v2 = vsub.f32 %v724_v34, %v787_v1 }
 0x40e   :  { %v838_v3 = vmul.f32 1.442695, %v1556_v0 }
 0x40f   :  { %v793_v4 = vpop.xlane.xlu1 %792  ;;  %v834_v5 = vmul.f32 1.442695, %v1558_v2 }
 0x410   :  { %1242 = vpow2.f32 %v838_v3  ;;  %v789_v6 = vpop.xlane.xlu0 %788  ;;  %v1562_v7 = vsub.f32 %v735_v38, %v793_v4 }
 0x411   :  { %v1564_v8 = vsub.f32 %v727_v37, %v789_v6  ;;  %1244 = vpow2.f32 %v834_v5 }
 0x412   :  { %v840_v11 = vmul.f32 1.442695, %v1562_v7 }
 0x413   :  { %v836_v9 = vmul.f32 1.442695, %v1564_v8 }
 0x414   :  { %v795_v10 = vpop.xlane.xlu0 %794 }
 0x415   :  { %1246 = vpow2.f32 %v836_v9  ;;  %v1570_v14 = vsub.f32 %v740_v41, %v795_v10 }
 0x416   :  { %v797_v12 = vpop.xlane.xlu1 %796  ;;  %1248 = vpow2.f32 %v840_v11 }
 0x417   :  { %v1568_v13 = vsub.f32 %v743_v44, %v797_v12  ;;  %v842_v22 = vmul.f32 1.442695, %v1570_v14 }
 0x418   :  { %v799_v15 = vpop.xlane.xlu0 %798 }
 0x419   :  { %v844_v16 = vmul.f32 1.442695, %v1568_v13  ;;  %v1573_v17 = vsub.f32 %v748_v45, %v799_v15 }
 0x41a   :  { %v1243_v18 = vpop.eup %1242  ;;  %v801_v19 = vpop.xlane.xlu1 %800 }
 0x41b   :  { %v846_v20 = vmul.f32 1.442695, %v1573_v17  ;;  %v1576_v21 = vsub.f32 %v751_v46, %v801_v19  ;;  %870 = vadd.xlane.f32.xlu0 %v1243_v18  ;;  %1250 = vpow2.f32 %v844_v16  ;;  %v1245_v25 = vpop.eup %1244 }
 0x41c   :  { %v803_v23 = vpop.xlane.xlu0 %802 }
 0x41d   :  { %1252 = vpow2.f32 %v846_v20  ;;  %v848_v24 = vmul.f32 1.442695, %v1576_v21  ;;  %v1582_v29 = vsub.f32 %v756_v49, %v803_v23 }
 0x41e   :  { %v805_v26 = vpop.xlane.xlu1 %804  ;;  %1254 = vpow2.f32 %v842_v22 }
 0x41f   :  { %v1247_v27 = vpop.eup %1246  ;;  %v1580_v28 = vsub.f32 %v759_v52, %v805_v26  ;;  %866 = vadd.xlane.f32.xlu0 %v1245_v25  ;;  %1256 = vpow2.f32 %v848_v24  ;;  %v850_v38 = vmul.f32 1.442695, %v1582_v29 }
 0x420   :  { %868 = vadd.xlane.f32.xlu1 %v1247_v27  ;;  %v807_v30 = vpop.xlane.xlu0 %806  ;;  %v1249_v34 = vpop.eup %1248 }
 0x421   :  { %v852_v31 = vmul.f32 1.442695, %v1580_v28  ;;  %v1585_v32 = vsub.f32 %v764_v53, %v807_v30 }
 0x422   :  { %v809_v33 = vpop.xlane.xlu1 %808 }
 0x423   :  { %v854_v35 = vmul.f32 1.442695, %v1585_v32  ;;  %v1589_v36 = vsub.f32 %v1541_v54, %v809_v33  ;;  %1258 = vpow2.f32 %v852_v31 }
 0x424   :  { %872 = vadd.xlane.f32.xlu1 %v1249_v34  ;;  %v811_v37 = vpop.xlane.xlu0 %810 }
 0x425   :  { %1260 = vpow2.f32 %v854_v35  ;;  %v856_v39 = vmul.f32 1.442695, %v1589_v36  ;;  %v1251_v40 = vpop.eup %1250  ;;  %v1597_v44 = vsub.f32 %v1543_v57, %v811_v37 }
 0x426   :  { %v813_v41 = vpop.xlane.xlu1 %812  ;;  %1262 = vpow2.f32 %v850_v38 }
 0x427   :  { %v1253_v42 = vpop.eup %1252  ;;  %v1594_v43 = vsub.f32 %v1548_v61, %v813_v41  ;;  %1264 = vpow2.f32 %v856_v39  ;;  %v858_v53 = vmul.f32 1.442695, %v1597_v44 }
 0x428   :  { %876 = vadd.xlane.f32.xlu1 %v1251_v40  ;;  %878 = vadd.xlane.f32.xlu0 %v1253_v42  ;;  %v815_v45 = vpop.xlane.xlu0 %814  ;;  %v1255_v48 = vpop.eup %1254 }
 0x429   :  { %v860_v46 = vmul.f32 1.442695, %v1594_v43  ;;  %v1601_v47 = vsub.f32 %v1546_v60, %v815_v45  ;;  %v1257_v50 = vpop.eup %1256 }
 0x42a   :  { %v817_v49 = vpop.xlane.xlu1 %816 }
 0x42b   :  { %v862_v51 = vmul.f32 1.442695, %v1601_v47  ;;  %v1605_v52 = vsub.f32 %v1551_v62, %v817_v49  ;;  %1266 = vpow2.f32 %v860_v46 }
 0x42c   :  { %880 = vadd.xlane.f32.xlu1 %v1257_v50  ;;  %874 = vadd.xlane.f32.xlu0 %v1255_v48 }
 0x42d   :  { %1268 = vpow2.f32 %v862_v51  ;;  %v864_v54 = vmul.f32 1.442695, %v1605_v52  ;;  %v1259_v55 = vpop.eup %1258 }
 0x42e   :  { %1270 = vpow2.f32 %v858_v53 }
 0x42f   :  { %v1261_v56 = vpop.eup %1260  ;;  %1272 = vpow2.f32 %v864_v54 }
 0x430   :  { %884 = vadd.xlane.f32.xlu1 %v1259_v55  ;;  %886 = vadd.xlane.f32.xlu0 %v1261_v56  ;;  %v1263_v57 = vpop.eup %1262 }
 0x431   :  { %v1265_v58 = vpop.eup %1264 }
 0x434   :  { %888 = vadd.xlane.f32.xlu1 %v1265_v58  ;;  %882 = vadd.xlane.f32.xlu0 %v1263_v57 }
 0x435   :  { %v1267_v59 = vpop.eup %1266 }
 0x437   :  { %v1269_v60 = vpop.eup %1268 }
 0x438   :  { %892 = vadd.xlane.f32.xlu1 %v1267_v59  ;;  %894 = vadd.xlane.f32.xlu0 %v1269_v60  ;;  %v1271_v61 = vpop.eup %1270 }
 0x439   :  { %v1273_v62 = vpop.eup %1272 }
 0x43c   :  { %896 = vadd.xlane.f32.xlu1 %v1273_v62  ;;  %890 = vadd.xlane.f32.xlu0 %v1271_v61 }
 0x4a8   :  { %v871_v63 = vpop.xlane.xlu0 %870 }
 0x4ac   :  { %v867_v1 = vpop.xlane.xlu0 %866 }
 0x4ad   :  { %1274 = vlog2.f32 %v867_v1  ;;  %v869_v3 = vpop.xlane.xlu1 %868 }
 0x4ae   :  { %1276 = vlog2.f32 %v869_v3 }
 0x4af   :  { %1278 = vlog2.f32 %v871_v63 }
 0x4b1   :  { %v873_v4 = vpop.xlane.xlu1 %872 }
 0x4b2   :  { %1280 = vlog2.f32 %v873_v4 }
 0x4b5   :  { %v879_v5 = vpop.xlane.xlu0 %878  ;;  %v877_v15 = vpop.xlane.xlu1 %876 }
 0x4b7   :  { %v1275_v6 = vpop.eup %1274 }
 0x4b8   :  { %v1277_v9 = vpop.eup %1276  ;;  %v899_v10 = vmul.f32 0.6931472, %v1275_v6 }
 0x4b9   :  { %v875_v11 = vpop.xlane.xlu0 %874  ;;  %v901_v12 = vmul.f32 0.6931472, %v1277_v9  ;;  %v1279_v18 = vpop.eup %1278 }
 0x4ba   :  { %v930_v16 = vsub.f32 %v1558_v2, %v899_v10  ;;  %1282 = vlog2.f32 %v875_v11  ;;  %v903_v19 = vmul.f32 0.6931472, %v1279_v18  ;;  %v881_v25 = vpop.xlane.xlu1 %880 }
 0x4bb   :  { %1284 = vlog2.f32 %v877_v15  ;;  %v931_v20 = vsub.f32 %v1564_v8, %v901_v12 }
 0x4bc   :  { %946 = vxpose.xlu0.b32.start [1/16] (narrow) %v930_v16, 8  ;;  %v1281_v22 = vpop.eup %1280  ;;  %1286 = vlog2.f32 %v879_v5  ;;  %v932_v26 = vsub.f32 %v1556_v0, %v903_v19 }
 0x4bd   :  { %v887_v23 = vpop.xlane.xlu0 %886  ;;  %v905_v24 = vmul.f32 0.6931472, %v1281_v22  ;;  %1288 = vlog2.f32 %v881_v25 }
 0x4be   :  { %v885_v8 = vpop.xlane.xlu1 %884 }
 0x4bf   :  { %v933_v31 = vsub.f32 %v1562_v7, %v905_v24 }
 0x4c0   :  { %947 = vxpose.xlu0.b32.cont [2/16] (narrow) %v931_v20, 8 }
 0x4c1   :  { %v883_v2 = vpop.xlane.xlu0 %882 }
 0x4c2   :  { %1290 = vlog2.f32 %v883_v2  ;;  %v889_v42 = vpop.xlane.xlu1 %888 }
 0x4c3   :  { %1292 = vlog2.f32 %v885_v8 }
 0x4c4   :  { %948 = vxpose.xlu0.b32.cont [3/16] (narrow) %v932_v26, 8  ;;  %v1283_v27 = vpop.eup %1282  ;;  %1294 = vlog2.f32 %v887_v23 }
 0x4c5   :  { %v907_v30 = vmul.f32 0.6931472, %v1283_v27  ;;  %v1285_v33 = vpop.eup %1284  ;;  %v895_v40 = vpop.xlane.xlu0 %894  ;;  %1296 = vlog2.f32 %v889_v42 }
 0x4c6   :  { %v909_v34 = vmul.f32 0.6931472, %v1285_v33  ;;  %v1287_v38 = vpop.eup %1286 }
 0x4c7   :  { %v934_v35 = vsub.f32 %v1570_v14, %v907_v30  ;;  %v911_v37 = vmul.f32 0.6931472, %v1287_v38  ;;  %v1289_v39 = vpop.eup %1288 }
 0x4c8   :  { %949 = vxpose.xlu0.b32.cont [4/16] (narrow) %v933_v31, 8  ;;  %v935_v0 = vsub.f32 %v1568_v13, %v909_v34  ;;  %v913_v41 = vmul.f32 0.6931472, %v1289_v39  ;;  %v893_v13 = vpop.xlane.xlu1 %892 }
 0x4c9   :  { %v936_v7 = vsub.f32 %v1573_v17, %v911_v37  ;;  %v891_v48 = vpop.xlane.xlu0 %890 }
 0x4ca   :  { %v937_v14 = vsub.f32 %v1576_v21, %v913_v41  ;;  %1298 = vlog2.f32 %v891_v48 }
 0x4cb   :  { %1300 = vlog2.f32 %v893_v13 }
 0x4cc   :  { %950 = vxpose.xlu0.b32.cont [5/16] (narrow) %v934_v35, 8  ;;  %v1291_v45 = vpop.eup %1290  ;;  %1302 = vlog2.f32 %v895_v40  ;;  %v897_v57 = vpop.xlane.xlu1 %896 }
 0x4cd   :  { %v915_v46 = vmul.f32 0.6931472, %v1291_v45  ;;  %v1293_v49 = vpop.eup %1292  ;;  %1304 = vlog2.f32 %v897_v57 }
 0x4ce   :  { %v917_v50 = vmul.f32 0.6931472, %v1293_v49  ;;  %v1295_v53 = vpop.eup %1294 }
 0x4cf   :  { %v938_v51 = vsub.f32 %v1582_v29, %v915_v46  ;;  %v919_v54 = vmul.f32 0.6931472, %v1295_v53  ;;  %v1297_v55 = vpop.eup %1296 }
 0x4d0   :  { %951 = vxpose.xlu0.b32.cont [6/16] (narrow) %v935_v0, 8  ;;  %v939_v17 = vsub.f32 %v1580_v28, %v917_v50  ;;  %v921_v56 = vmul.f32 0.6931472, %v1297_v55 }
 0x4d1   :  { %v940_v21 = vsub.f32 %v1585_v32, %v919_v54 }
 0x4d2   :  { %v941_v60 = vsub.f32 %v1589_v36, %v921_v56 }
 0x4d4   :  { %952 = vxpose.xlu0.b32.cont [7/16] (narrow) %v936_v7, 8  ;;  %v1299_v58 = vpop.eup %1298 }
 0x4d5   :  { %v923_v59 = vmul.f32 0.6931472, %v1299_v58  ;;  %v1301_v29 = vpop.eup %1300 }
 0x4d6   :  { %v925_v61 = vmul.f32 0.6931472, %v1301_v29  ;;  %v1303_v63 = vpop.eup %1302 }
 0x4d7   :  { %v942_v62 = vsub.f32 %v1597_v44, %v923_v59  ;;  %v927_v28 = vmul.f32 0.6931472, %v1303_v63  ;;  %v1305_v3 = vpop.eup %1304 }
 0x4d8   :  { %953 = vxpose.xlu0.b32.cont [8/16] (narrow) %v937_v14, 8  ;;  %v943_v1 = vsub.f32 %v1594_v43, %v925_v61  ;;  %v929_v4 = vmul.f32 0.6931472, %v1305_v3 }
 0x4d9   :  { %v944_v32 = vsub.f32 %v1601_v47, %v927_v28 }
 0x4da   :  { %v945_v5 = vsub.f32 %v1605_v52, %v929_v4 }
 0x4dc   :  { %954 = vxpose.xlu0.b32.cont [9/16] (narrow) %v938_v51, 8 }
 0x4e0   :  { %955 = vxpose.xlu0.b32.cont [10/16] (narrow) %v939_v17, 8 }
 0x4e4   :  { %956 = vxpose.xlu0.b32.cont [11/16] (narrow) %v940_v21, 8 }
 0x4e8   :  { %957 = vxpose.xlu0.b32.cont [12/16] (narrow) %v941_v60, 8 }
 0x4ec   :  { %958 = vxpose.xlu0.b32.cont [13/16] (narrow) %v942_v62, 8 }
 0x4f0   :  { %959 = vxpose.xlu0.b32.cont [14/16] (narrow) %v943_v1, 8 }
 0x4f4   :  { %960 = vxpose.xlu0.b32.cont [15/16] (narrow) %v944_v32, 8 }
 0x4f8   :  { %961 = vxpose.xlu0.b32.end [16/16] (narrow) %v945_v5, 8 }
 0x53c   :  { %v962_v36 = vpop.trf.xlu0 }
 0x53d   :  { %978 = vst [vmem:[%s1637_s9] sm:$0xff] %v962_v36 }

</bundles_post_ra>
